<compile_context>
chip_gen: v7x
topology: tpu7x:2x2x1
jax: 0.10.0
libtpu: 0.0.40
codegen_flags: <defaults>
</compile_context>

<pallas_src>
import jax
import jax.numpy as jnp
from jax.experimental import pallas as pl
from jax.experimental.pallas import tpu as pltpu


def _round_up(x, m):
    return ((x + m - 1) // m) * m


def _pad2(arr, rows, cols):
    r, c = arr.shape
    return jnp.pad(arr, ((0, rows - r), (0, cols - c)))


# --------------------------------------------------------------------------
# Kernels
# --------------------------------------------------------------------------

def _propagate_kernel(a_ref, x_ref, y_ref):
    """One row-tile of a propagation step: Y[i*TM:(i+1)*TM] = A_tile @ X."""
    y = jnp.dot(a_ref[...], x_ref[...], preferred_element_type=jnp.float32)
    y_ref[...] = y.astype(y_ref.dtype)


def _final_kernel(a_ref, x_ref, w1_ref, b1_ref, w2_ref, b2_ref,
                  h_ref, logits_ref):
    """Fused last propagation step + SGConv fc + classification head (per row-tile)."""
    y = jnp.dot(a_ref[...], x_ref[...], preferred_element_type=jnp.float32)
    h = jnp.dot(y, w1_ref[...], preferred_element_type=jnp.float32) + b1_ref[...]
    h_ref[...] = h.astype(h_ref.dtype)
    logits = jnp.dot(h, w2_ref[...], preferred_element_type=jnp.float32) + b2_ref[...]
    logits_ref[...] = logits.astype(logits_ref.dtype)


# --------------------------------------------------------------------------
# pallas_call wrappers
# --------------------------------------------------------------------------

_COMPILER_PARAMS = pltpu.CompilerParams(
    dimension_semantics=("parallel",),          # row tiles are independent
    vmem_limit_bytes=48 * 1024 * 1024,          # headroom on v7x's 64 MiB VMEM
)


def _propagate(a_pad, x_pad, tm):
    n_pad = a_pad.shape[0]
    f_pad = x_pad.shape[1]
    cost = pl.CostEstimate(
        flops=2 * n_pad * n_pad * f_pad,
        transcendentals=0,
        bytes_accessed=(a_pad.size * a_pad.dtype.itemsize
                        + x_pad.size * x_pad.dtype.itemsize
                        + n_pad * f_pad * 2),
    )
    return pl.pallas_call(
        _propagate_kernel,
        out_shape=jax.ShapeDtypeStruct((n_pad, f_pad), jnp.bfloat16),
        grid=(n_pad // tm,),
        in_specs=[
            pl.BlockSpec((tm, n_pad), lambda i: (i, 0)),      # stream A row-tiles
            pl.BlockSpec((n_pad, f_pad), lambda i: (0, 0)),   # X resident in VMEM
        ],
        out_specs=pl.BlockSpec((tm, f_pad), lambda i: (i, 0)),
        compiler_params=_COMPILER_PARAMS,
        cost_estimate=cost,
    )(a_pad, x_pad)


def _final(a_pad, x_pad, w1, b1, w2, b2, tm):
    n_pad = a_pad.shape[0]
    f_pad = x_pad.shape[1]
    h_pad = w1.shape[1]
    c_pad = w2.shape[1]
    cost = pl.CostEstimate(
        flops=(2 * n_pad * n_pad * f_pad
               + 2 * n_pad * f_pad * h_pad
               + 2 * n_pad * h_pad * c_pad),
        transcendentals=0,
        bytes_accessed=(a_pad.size * a_pad.dtype.itemsize
                        + x_pad.size * x_pad.dtype.itemsize
                        + (w1.size + b1.size + w2.size + b2.size) * 4
                        + n_pad * (h_pad + c_pad) * 4),
    )
    return pl.pallas_call(
        _final_kernel,
        out_shape=(
            jax.ShapeDtypeStruct((n_pad, h_pad), jnp.float32),
            jax.ShapeDtypeStruct((n_pad, c_pad), jnp.float32),
        ),
        grid=(n_pad // tm,),
        in_specs=[
            pl.BlockSpec((tm, n_pad), lambda i: (i, 0)),      # stream A row-tiles
            pl.BlockSpec((n_pad, f_pad), lambda i: (0, 0)),   # X resident
            pl.BlockSpec((f_pad, h_pad), lambda i: (0, 0)),   # W_sgc resident
            pl.BlockSpec((1, h_pad), lambda i: (0, 0)),       # b_sgc resident
            pl.BlockSpec((h_pad, c_pad), lambda i: (0, 0)),   # W_head resident
            pl.BlockSpec((1, c_pad), lambda i: (0, 0)),       # b_head resident
        ],
        out_specs=(
            pl.BlockSpec((tm, h_pad), lambda i: (i, 0)),
            pl.BlockSpec((tm, c_pad), lambda i: (i, 0)),
        ),
        compiler_params=_COMPILER_PARAMS,
        cost_estimate=cost,
    )(a_pad, x_pad, w1, b1, w2, b2)


def sgc_forward(a_norm, x, w_sgc, b_sgc, w_head, b_head, *, k=2, row_tile=256):
    """Returns (h, logits) just like SGC.forward."""
    if k < 1:
        raise ValueError("k must be >= 1 (SGConv default is 2)")

    n, f = x.shape
    h_dim = w_sgc.shape[1]
    c_dim = w_head.shape[1]

    # Row tile: multiple of 8 (sublane), <= row_tile, dividing the padded N.
    tm = min(row_tile, _round_up(n, 8))
    n_pad = _round_up(n, tm)
    # Lane dims padded to 128 -> unmasked stores + full MXU columns.
    f_pad = _round_up(f, 128)
    h_pad = _round_up(h_dim, 128)
    c_pad = _round_up(c_dim, 128)

    # bf16 for the O(N^2) adjacency stream and propagated features; the small
    # fc weights stay f32.  All matmuls accumulate in f32.
    a_p = _pad2(a_norm.astype(jnp.float32), n_pad, n_pad).astype(jnp.bfloat16)
    x_p = _pad2(x.astype(jnp.float32), n_pad, f_pad).astype(jnp.bfloat16)
    w1_p = _pad2(w_sgc.astype(jnp.float32), f_pad, h_pad)
    b1_p = _pad2(b_sgc.reshape(1, -1).astype(jnp.float32), 1, h_pad)
    w2_p = _pad2(w_head.astype(jnp.float32), h_pad, c_pad)
    b2_p = _pad2(b_head.reshape(1, -1).astype(jnp.float32), 1, c_pad)

    # Note: if n_hidden padded were narrower than in_feats padded, it would be
    # cheaper (associativity) to apply W_sgc before propagating; after the
    # 128-lane padding both widths are equal here, so keep the original order.

    # k-1 standalone tiled propagation steps (full-graph dependency prevents
    # fusing them into one row-tiled grid), then one fused final kernel.
    for _ in range(k - 1):
        x_p = _propagate(a_p, x_p, tm)
    h_full, logits_full = _final(a_p, x_p, w1_p, b1_p, w2_p, b2_p, tm)

    return h_full[:n, :h_dim], logits_full[:n, :c_dim]


# --------------------------------------------------------------------------
# Deterministic example inputs + reference check
# --------------------------------------------------------------------------

def _build_graph(n_nodes):
    """Deterministic ring graph + self loops, symmetric normalization."""
    idx = jnp.arange(n_nodes)
    adj = jnp.zeros((n_nodes, n_nodes), jnp.float32)
    adj = adj.at[idx, (idx + 1) % n_nodes].set(1.0)
    adj = adj.at[(idx + 1) % n_nodes, idx].set(1.0)
    adj = adj + jnp.eye(n_nodes, dtype=jnp.float32)           # self loops
    deg = adj.sum(axis=1)
    d_inv_sqrt = 1.0 / jnp.sqrt(deg)
    return adj * d_inv_sqrt[:, None] * d_inv_sqrt[None, :]    # D^-1/2 A D^-1/2


def _linear_init(key, fan_in, fan_out):
    """Deterministic PyTorch-Linear-style init (uniform +-1/sqrt(fan_in))."""
    kw, kb = jax.random.split(key)
    bound = 1.0 / jnp.sqrt(jnp.float32(fan_in))
    w = jax.random.uniform(kw, (fan_in, fan_out), jnp.float32, -bound, bound)
    b = jax.random.uniform(kb, (1, fan_out), jnp.float32, -bound, bound)
    return w, b


if __name__ == "__main__":
    # Small shapes consistent with the module's forward.
    n_nodes, in_feats, n_hidden, n_classes, k = 16, 8, 32, 4, 2

    key = jax.random.PRNGKey(0)
    k_x, k_sgc, k_head = jax.random.split(key, 3)

    x = jax.random.normal(k_x, (n_nodes, in_feats), jnp.float32)
    a_norm = _build_graph(n_nodes)
    w_sgc, b_sgc = _linear_init(k_sgc, in_feats, n_hidden)       # SGConv fc
    w_head, b_head = _linear_init(k_head, n_hidden, n_classes)   # nn.Linear head

    h, logits = sgc_forward(a_norm, x, w_sgc, b_sgc, w_head, b_head, k=k)
    jax.block_until_ready((h, logits))

    # Reference check against plain-JAX f32 math (same semantics as the module).
    xp = x
    for _ in range(k):
        xp = a_norm @ xp
    h_ref = xp @ w_sgc + b_sgc
    logits_ref = h_ref @ w_head + b_head

    # Tolerance relaxed because the A@X stream runs in bf16 (f32 accumulation).
    assert h.shape == (n_nodes, n_hidden) and logits.shape == (n_nodes, n_classes)
    assert jnp.allclose(h, h_ref, atol=3e-2, rtol=3e-2), "h mismatch"
    assert jnp.allclose(logits, logits_ref, atol=3e-2, rtol=3e-2), "logits mismatch"

    print("KERNEL_OK")
</pallas_src>

<mosaic_0001>
module attributes {stable_mosaic.version = 11 : i64} {
  func.func @_propagate_kernel(%arg0: i32, %arg1: memref<16x16xbf16, #tpu.memory_space<vmem>>, %arg2: memref<16x128xbf16, #tpu.memory_space<vmem>>, %arg3: memref<16x128xbf16, #tpu.memory_space<vmem>>) attributes {dimension_semantics = [#tpu.dimension_semantics<parallel>], iteration_bounds = array<i64: 1>, scalar_prefetch = 0 : i64, scratch_operands = 0 : i64, tpu.core_type = #tpu.core_type<tc>, window_params = [{transform_indices = @transform_0, window_bounds = array<i64: 16, 16>}, {pipeline_mode = #tpu.pipeline_mode<synchronous>, transform_indices = @transform_1, window_bounds = array<i64: 16, 128>}, {transform_indices = @transform_2, window_bounds = array<i64: 16, 128>}]} {
    %c0 = arith.constant 0 : index
    %c0_0 = arith.constant 0 : index
    %0 = vector.load %arg1[%c0, %c0_0] : memref<16x16xbf16, #tpu.memory_space<vmem>>, vector<16x16xbf16>
    %c0_1 = arith.constant 0 : index
    %c0_2 = arith.constant 0 : index
    %1 = vector.load %arg2[%c0_1, %c0_2] : memref<16x128xbf16, #tpu.memory_space<vmem>>, vector<16x128xbf16>
    %cst = arith.constant dense<0.000000e+00> : vector<16x128xf32>
    %2 = tpu.matmul %0, %1, %cst {dimension_numbers = #tpu.dot_dimension_numbers<[1], [0], [0], [1], [0, 0, 1, 1], [], []>} : vector<16x16xbf16>, vector<16x128xbf16>, vector<16x128xf32> -> vector<16x128xf32>
    %3 = arith.truncf %2 : vector<16x128xf32> to vector<16x128xbf16>
    %c0_3 = arith.constant 0 : index
    %c0_4 = arith.constant 0 : index
    %4 = vector.load %arg3[%c0_3, %c0_4] : memref<16x128xbf16, #tpu.memory_space<vmem>>, vector<16x128xbf16>
    tpu.vector_store %arg3[%c0_3, %c0_4], %3 {strides = array<i32>} : memref<16x128xbf16, #tpu.memory_space<vmem>>, vector<16x128xbf16>,
    return
  }
  func.func @transform_0(%arg0: i32) -> (i32, i32) {
    %c0_i32 = arith.constant 0 : i32
    %c0_i32_0 = arith.constant 0 : i32
    return %arg0, %c0_i32 : i32, i32
  }
  func.func @transform_1(%arg0: i32) -> (i32, i32) {
    %c0_i32 = arith.constant 0 : i32
    %c0_i32_0 = arith.constant 0 : i32
    %c0_i32_1 = arith.constant 0 : i32
    return %c0_i32, %c0_i32_0 : i32, i32
  }
  func.func @transform_2(%arg0: i32) -> (i32, i32) {
    %c0_i32 = arith.constant 0 : i32
    %c0_i32_0 = arith.constant 0 : i32
    return %arg0, %c0_i32 : i32, i32
  }
}

</mosaic_0001>

<bundles_post_ra>
// kernel: tpu_custom_call.1
= control target key start
LH: loop header
LB: loop body
LE: loop exit
PB: predicated region body
PF: predicated region fallthrough
CT: control target
= control target key end

     0   :  { %7 = vsyncpa [#allocation3], 0  ;;  %s297_s0 = inlined_call_operand.hbm [shape: bf16[16,16], index: 0, kind: input, shape index: {}]   ;;  %s298_s1 = inlined_call_operand.hbm [shape: bf16[16,128], index: 1, kind: input, shape index: {}]   ;;  %s299_s2 = inlined_call_operand.hbm [shape: bf16[16,128], index: 2, kind: output, shape index: {}]  }
   0x1   :  { %8 = vsyncpa [#allocation6], 0 }
   0x2   :  { %9 = vsyncpa [#allocation4], 0  ;;  %s230_s9 = smov [#allocation2]   ;;  %s158_s13 = scalar_lea.hbm %s297_s0, 128 }
   0x3   :  { %s15_s10 = sshll.u32 %s230_s9, 4  ;;  %p159_p0 = scmp.ne.s32.totalorder %s297_s0, %s158_s13  ;;  %s16_s10 = int_to_ptr.vmem [resolvable:$true] %s15_s10 }
   0x4   :  { %p162_p1 = scmp.lt.u32.totalorder %s158_s13, %s297_s0 }
   0x6   :  { %p164_p2 = pnand %p162_p1, %p159_p0 }
   0x8   :  { %167 = shalt.err (!%p164_p2)
}
   0x9   :  { %s168_s18 = scalar_lea.vmem %s16_s10, 128  ;;  %p173_p4 = scmp.lt.s32.totalorder %s16_s10, %s16_s10 }
   0xa   :  { %p169_p3 = scmp.ne.s32.totalorder %s16_s10, %s168_s18  ;;  %p174_p5 = scmp.lt.s32.totalorder %s168_s18, %s168_s18 }
   0xc   :  { %p175_p6 = por %p174_p5, %p173_p4 }
   0xe   :  { %p176_p7 = pnand %p175_p6, %p169_p3 }
  0x10   :  { %179 = shalt.err (!%p176_p7)
}
  0x11   :  { %s231_s19 = smov 64   ;;  %s232_s20 = smov 4  }
  0x12   :  { %21 = dma.hbm_to_vmem [thread:$0]  %s297_s0, 128, %s16_s10, [#allocation3], %s231_s19, %s231_s19, %s232_s20  }
  0x13   :  { %s233_s23 = smov [#allocation5]   ;;  %s180_s27 = scalar_lea.hbm %s298_s1, 128 }
  0x14   :  { %s27_s24 = sshll.u32 %s233_s23, 4  ;;  %p181_p8 = scmp.ne.s32.totalorder %s298_s1, %s180_s27  ;;  %s28_s24 = int_to_ptr.vmem [resolvable:$true] %s27_s24 }
  0x15   :  { %p184_p9 = scmp.lt.u32.totalorder %s180_s27, %s298_s1 }
  0x17   :  { %p186_p10 = pnand %p184_p9, %p181_p8 }
  0x19   :  { %189 = shalt.err (!%p186_p10)
}
  0x1a   :  { %s190_s4 = scalar_lea.vmem %s28_s24, 128  ;;  %p195_p12 = scmp.lt.s32.totalorder %s28_s24, %s28_s24 }
  0x1b   :  { %p191_p11 = scmp.ne.s32.totalorder %s28_s24, %s190_s4  ;;  %p196_p13 = scmp.lt.s32.totalorder %s190_s4, %s190_s4 }
  0x1d   :  { %p197_p0 = por %p196_p13, %p195_p12 }
  0x1f   :  { %p198_p1 = pnand %p197_p0, %p191_p11 }
  0x21   :  { %201 = shalt.err (!%p198_p1)
}
  0x22   :  { %33 = dma.hbm_to_vmem [thread:$0]  %s298_s1, 128, %s28_s24, [#allocation6], %s231_s19, %s231_s19, %s232_s20  }
  0x23   :  { %224 = dma.done.wait [#allocation3], 128  }
  0x24   :  { %225 = vsyncadd [#allocation3], 4294967168 }
  0x25   :  { %226 = dma.done.wait [#allocation6], 128  }
  0x26   :  { %227 = vsyncadd [#allocation6], 4294967168  ;;  %v234_v0 = vmov 0.0   ;;  %vm235_vm0 = vmmov 0   ;;  %v156_v1 = vld [vmem:[#allocation5] sm:$0xff]   ;;  %v157_v2 = vld [vmem:[#allocation2] sm:$0xff]  }
  0x27   :  { %143 = vmatprep.subr.bf16.mxu0 %v234_v0  ;;  %145 = vmatprep.mubr.msk.bf16.mxu0 %vm235_vm0, %v234_v0  ;;  %vm56_vm1 = vcmask 130048   ;;  %s236_s6 = smov [#allocation7]  }
  0x28   :  { %144 = vmatpush3.bf16.msra.mxu0 %v156_v1  ;;  %s116_s7 = sshll.u32 %s236_s6, 4  ;;  %s117_s7 = int_to_ptr.vmem [resolvable:$true] %s116_s7 }
  0x29   :  { %s202_s1 = scalar_lea.vmem %s117_s7, 128  ;;  %p207_p3 = scmp.lt.s32.totalorder %s117_s7, %s117_s7 }
  0x2a   :  { %p203_p2 = scmp.ne.s32.totalorder %s117_s7, %s202_s1  ;;  %p208_p4 = scmp.lt.s32.totalorder %s202_s1, %s202_s1 }
  0x2b   :  { %146 = vmatmul.mubr.msk.bf16.vlgmr.msra.gmra.mrb[0].mxu0 %vm56_vm1, %v157_v2 }
  0x2c   :  { %p209_p5 = por %p208_p4, %p207_p3 }
  0x2e   :  { %p210_p6 = pnand %p209_p5, %p203_p2 }
  0xfe   :  { %v94_v3 = vpop.f32.mrb[0].mxu0 }
  0xff   :  { %v147_v4 = vpop.f32.mrb[1].mxu0 }
 0x100   :  { %v97_v5 = vpop.f32.mrb[2].mxu0 }
 0x101   :  { %v139_v6 = vpack.c.bf16 %v97_v5, %v94_v3  ;;  %v148_v7 = vpop.f32.mrb[3].mxu0 }
 0x103   :  { %140 = vst [vmem:[#allocation7] sm:$0xff] %v139_v6  }
 0x104   :  { %213 = shalt.err (!%p210_p6)
}
 0x105   :  { %s214_s10 = scalar_lea.hbm %s299_s2, 128 }
 0x106   :  { %p215_p7 = scmp.ne.s32.totalorder %s299_s2, %s214_s10  ;;  %p218_p8 = scmp.lt.u32.totalorder %s214_s10, %s299_s2 }
 0x108   :  { %p220_p9 = pnand %p218_p8, %p215_p7 }
 0x10a   :  { %223 = shalt.err (!%p220_p9)
}
 0x10b   :  { %122 = dma.vmem_to_hbm [thread:$0]  %s117_s7, 128, %s299_s2, [#allocation4], %s231_s19, %s231_s19, %s232_s20  }
 0x10c   :  { %228 = dma.done.wait [#allocation4], 128  }
 0x10d   :  { %229 = vsyncadd [#allocation4], 4294967168 }
 0x10e   :  { %126 = vsyncpa [#allocation3], 1 }
 0x10f   :  { %127 = vsyncpa [#allocation6], 1 }
 0x110   :  { %128 = vsyncpa [#allocation4], 1 }

</bundles_post_ra>
